<compile_context>
chip_gen: v7x
topology: tpu7x:2x2x1
jax: 0.10.0
libtpu: 0.0.40
codegen_flags: <defaults>
</compile_context>

<pallas_src>
import functools

import jax
import jax.numpy as jnp
from jax.experimental import pallas as pl
from jax.experimental.pallas import tpu as pltpu

_TW_MAX = 512                      # lane tile for the resize contraction axis
_VMEM_LIMIT = 48 * 1024 * 1024     # < 64 MiB physical VMEM on v7x


# ----------------------------- kernels ------------------------------------- #

def _pad_paste_kernel(img_ref, pad_ref, out_ref, *, top, left_c):
    """Single-step paste: lane-dense pad fill + one sub-block image store."""
    h, wc = img_ref.shape
    out_ref[...] = jnp.broadcast_to(pad_ref[...], out_ref.shape)
    img = img_ref[...].astype(jnp.int32).astype(jnp.float32)
    out_ref[pl.ds(top, h), pl.ds(left_c, wc)] = img


def _resize_pad_kernel(pad_ref, img_ref, rh_ref, rwt_ref, out_ref, acc_ref,
                       *, top, left):
    """Bilinear resize via bf16 MXU matmuls, K-tiled over the source width."""
    c = pl.program_id(0)
    k = pl.program_id(1)

    @pl.when(k == 0)
    def _init():
        acc_ref[...] = jnp.zeros_like(acc_ref)

    # (H, tw) uint8 plane tile -> bf16 for the MXU.
    x = img_ref[0].astype(jnp.int32).astype(jnp.float32).astype(jnp.bfloat16)
    tmp = jnp.dot(rh_ref[...], x, preferred_element_type=jnp.float32)   # (oh, tw)
    acc_ref[...] += jnp.dot(tmp.astype(jnp.bfloat16), rwt_ref[...],
                            preferred_element_type=jnp.float32)          # (oh, ow)

    @pl.when(k == pl.num_programs(1) - 1)
    def _finalize():
        oh, ow = acc_ref.shape
        pv = pad_ref[c]
        resized = jnp.clip(jnp.round(acc_ref[...]), 0.0, 255.0)
        out_ref[...] = jnp.full(out_ref.shape, pv, dtype=out_ref.dtype)
        out_ref[:, pl.ds(top, oh), pl.ds(left, ow)] = resized[None]


# ----------------------------- pallas_call wrappers ------------------------ #

def _run_pad_paste(img_flat_u8, pad_row, img_h, img_wc, top, left_c):
    h, wc = img_flat_u8.shape
    kern = functools.partial(_pad_paste_kernel, top=top, left_c=left_c)
    return pl.pallas_call(
        kern,
        out_shape=jax.ShapeDtypeStruct((img_h, img_wc), jnp.float32),
        grid=(1,),
        in_specs=[pl.BlockSpec((h, wc), lambda i: (0, 0)),
                  pl.BlockSpec((1, img_wc), lambda i: (0, 0))],
        out_specs=pl.BlockSpec((img_h, img_wc), lambda i: (0, 0)),
        compiler_params=pltpu.CompilerParams(
            dimension_semantics=("parallel",),
            vmem_limit_bytes=_VMEM_LIMIT),
    )(img_flat_u8, pad_row)


def _run_resize_pad(img_chw_u8, pad_vals, rh, rwt_p,
                    img_h, img_w, top, left, tw, kw):
    c, h, _ = img_chw_u8.shape
    new_h = rh.shape[0]
    new_w = rwt_p.shape[1]
    kern = functools.partial(_resize_pad_kernel, top=top, left=left)
    return pl.pallas_call(
        kern,
        out_shape=jax.ShapeDtypeStruct((c, img_h, img_w), jnp.float32),
        grid_spec=pltpu.PrefetchScalarGridSpec(
            num_scalar_prefetch=1,
            grid=(c, kw),
            in_specs=[
                pl.BlockSpec((1, h, tw), lambda ci, ki, pad: (ci, 0, ki)),
                pl.BlockSpec((new_h, h), lambda ci, ki, pad: (0, 0)),
                pl.BlockSpec((tw, new_w), lambda ci, ki, pad: (ki, 0)),
            ],
            out_specs=pl.BlockSpec((1, img_h, img_w),
                                   lambda ci, ki, pad: (ci, 0, 0)),
            scratch_shapes=[pltpu.VMEM((new_h, new_w), jnp.float32)],
        ),
        compiler_params=pltpu.CompilerParams(
            dimension_semantics=("parallel", "arbitrary"),
            vmem_limit_bytes=_VMEM_LIMIT),
    )(pad_vals, img_chw_u8, rh, rwt_p)


# ----------------------------- glue (plain JAX / Python) ------------------- #

def _as_size(img_size):
    if isinstance(img_size, int):
        return img_size, img_size
    return tuple(img_size)


def _pad_channel_values(pad_value, channels):
    """Normalize pad_value (scalar or per-channel) to a (C,) float32 vector."""
    pv = jnp.asarray(pad_value, jnp.float32).reshape(-1)
    return jnp.broadcast_to(pv, (channels,))


def _bilinear_matrix(out_size, in_size):
    """(out_size, in_size) bilinear interpolation matrix (half-pixel centers)."""
    scale = in_size / out_size
    dst = jnp.arange(out_size, dtype=jnp.float32)
    src = jnp.clip((dst + 0.5) * scale - 0.5, 0.0, float(in_size - 1))
    lo = jnp.floor(src).astype(jnp.int32)
    hi = jnp.minimum(lo + 1, in_size - 1)
    frac = src - lo.astype(jnp.float32)
    m = jnp.zeros((out_size, in_size), jnp.float32)
    rows = jnp.arange(out_size)
    m = m.at[rows, lo].add(1.0 - frac)
    m = m.at[rows, hi].add(frac)
    return m


def _resize_geometry(width, height, img_w, img_h):
    ratio_w = img_w / width
    ratio_h = img_h / height
    if ratio_w >= ratio_h:
        new_w = int(ratio_h * width)
        new_h = img_h
        left = (img_w - new_w) // 2
        top = 0
    else:
        new_h = int(ratio_w * height)
        new_w = img_w
        top = (img_h - new_h) // 2
        left = 0
    return new_w, new_h, left, top


def resize_pad(image_hwc, img_size, pad_value):
    """ResizePad.forward on an HWC uint8 array."""
    img_w, img_h = _as_size(img_size)
    height, width, ch = image_hwc.shape
    new_w, new_h, left, top = _resize_geometry(width, height, img_w, img_h)

    img_chw = jnp.transpose(image_hwc, (2, 0, 1))          # uint8, one byte pass
    pad_vals = _pad_channel_values(pad_value, ch)

    tw = width if width <= _TW_MAX else _TW_MAX
    kw = -(-width // tw)
    wpad = kw * tw

    rh = _bilinear_matrix(new_h, height).astype(jnp.bfloat16)
    rwt = _bilinear_matrix(new_w, width).T                  # (W, new_w)
    rwt_p = jnp.zeros((wpad, new_w), jnp.float32).at[:width, :].set(rwt)
    rwt_p = rwt_p.astype(jnp.bfloat16)

    out = _run_resize_pad(img_chw, pad_vals, rh, rwt_p,
                          img_h, img_w, top, left, tw, kw)
    return jnp.transpose(out, (1, 2, 0)).astype(jnp.uint8)


def remain_size(image_hwc, img_size, pad_value):
    """RemainSize.forward on an HWC uint8 array."""
    img_w, img_h = _as_size(img_size)
    height, width, ch = image_hwc.shape
    if width <= img_w and height <= img_h:
        left = (img_w - width) // 2
        top = (img_h - height) // 2
        pad_vals = _pad_channel_values(pad_value, ch)
        pad_row = jnp.tile(pad_vals, (img_w,)).reshape(1, img_w * ch)
        img_flat = image_hwc.reshape(height, width * ch)    # uint8, free reshape
        out = _run_pad_paste(img_flat, pad_row, img_h, img_w * ch,
                             top, left * ch)
        return out.reshape(img_h, img_w, ch).astype(jnp.uint8)
    return resize_pad(image_hwc, img_size, pad_value)


# ----------------------------- demo ---------------------------------------- #

if __name__ == "__main__":
    key = jax.random.PRNGKey(0)
    img_size = 16                 # -> (16, 16) target canvas
    pad_value = (128, 64, 32)     # per-channel pad value ("RGB")

    k1, k2 = jax.random.split(key)

    # Case 1: image fits inside the target -> centered paste branch (exact).
    small = jax.random.randint(k1, (12, 10, 3), 0, 256,
                               dtype=jnp.int32).astype(jnp.uint8)
    out_small = jax.block_until_ready(remain_size(small, img_size, pad_value))

    ref_small = jnp.broadcast_to(jnp.asarray(pad_value, jnp.uint8), (16, 16, 3))
    top, left = (16 - 12) // 2, (16 - 10) // 2
    ref_small = ref_small.at[top:top + 12, left:left + 10, :].set(small)
    assert out_small.shape == (16, 16, 3) and out_small.dtype == jnp.uint8
    assert bool(jnp.all(out_small == ref_small))

    # Case 2: image larger than target -> ResizePad (bf16 MXU resize) branch.
    big = jax.random.randint(k2, (20, 24, 3), 0, 256,
                             dtype=jnp.int32).astype(jnp.uint8)
    out_big = jax.block_until_ready(remain_size(big, img_size, pad_value))
    assert out_big.shape == (16, 16, 3) and out_big.dtype == jnp.uint8

    # f32 reference using the same bilinear matrices (kernel runs bf16 on MXU).
    new_w, new_h, left, top = _resize_geometry(24, 20, 16, 16)
    rh32 = _bilinear_matrix(new_h, 20)
    rw32 = _bilinear_matrix(new_w, 24)
    res32 = jnp.einsum('oh,hwc,vw->ovc', rh32, big.astype(jnp.float32), rw32)
    res32 = jnp.clip(jnp.round(res32), 0.0, 255.0)
    ref_big = jnp.broadcast_to(jnp.asarray(pad_value, jnp.float32), (16, 16, 3))
    ref_big = ref_big.at[top:top + new_h, left:left + new_w, :].set(res32)
    max_err = jnp.max(jnp.abs(out_big.astype(jnp.int32)
                              - ref_big.astype(jnp.int32)))
    assert int(max_err) <= 6, f"resize mismatch: max abs err {int(max_err)}"
    # Padded border rows must match the pad value exactly.
    assert bool(jnp.all(out_big[0] == jnp.asarray(pad_value, jnp.uint8)))

    print("KERNEL_OK")
</pallas_src>

<mosaic_0001>
module attributes {stable_mosaic.version = 11 : i64} {
  func.func @_pad_paste_kernel(%arg0: i32, %arg1: memref<12x30xi8, #tpu.memory_space<vmem>>, %arg2: memref<1x48xf32, #tpu.memory_space<vmem>>, %arg3: memref<16x48xf32, #tpu.memory_space<vmem>>) attributes {dimension_semantics = [#tpu.dimension_semantics<parallel>], iteration_bounds = array<i64: 1>, scalar_prefetch = 0 : i64, scratch_operands = 0 : i64, tpu.core_type = #tpu.core_type<tc>, window_params = [{pipeline_mode = #tpu.pipeline_mode<synchronous>, transform_indices = @transform_0, window_bounds = array<i64: 12, 30>}, {pipeline_mode = #tpu.pipeline_mode<synchronous>, transform_indices = @transform_1, window_bounds = array<i64: 1, 48>}, {pipeline_mode = #tpu.pipeline_mode<synchronous>, transform_indices = @transform_2, window_bounds = array<i64: 16, 48>}]} {
    %c0 = arith.constant 0 : index
    %c0_0 = arith.constant 0 : index
    %0 = vector.load %arg2[%c0, %c0_0] : memref<1x48xf32, #tpu.memory_space<vmem>>, vector<1x48xf32>
    %1 = vector.shape_cast %0 : vector<1x48xf32> to vector<1x48xf32>
    %2 = vector.broadcast %1 : vector<1x48xf32> to vector<16x48xf32>
    %c0_1 = arith.constant 0 : index
    %c0_2 = arith.constant 0 : index
    %3 = vector.load %arg3[%c0_1, %c0_2] : memref<16x48xf32, #tpu.memory_space<vmem>>, vector<16x48xf32>
    tpu.vector_store %arg3[%c0_1, %c0_2], %2 {strides = array<i32>} : memref<16x48xf32, #tpu.memory_space<vmem>>, vector<16x48xf32>,
    %c0_3 = arith.constant 0 : index
    %c0_4 = arith.constant 0 : index
    %4 = vector.load %arg1[%c0_3, %c0_4] : memref<12x30xi8, #tpu.memory_space<vmem>>, vector<12x30xi8>
    %5 = arith.extui %4 : vector<12x30xi8> to vector<12x30xi32>
    %6 = arith.sitofp %5 : vector<12x30xi32> to vector<12x30xf32>
    %c2 = arith.constant 2 : index
    %c9 = arith.constant 9 : index
    %7 = vector.load %arg3[%c2, %c9] : memref<16x48xf32, #tpu.memory_space<vmem>>, vector<12x30xf32>
    tpu.vector_store %arg3[%c2, %c9], %6 {strides = array<i32>} : memref<16x48xf32, #tpu.memory_space<vmem>>, vector<12x30xf32>,
    return
  }
  func.func @transform_0(%arg0: i32) -> (i32, i32) {
    %c0_i32 = arith.constant 0 : i32
    %c0_i32_0 = arith.constant 0 : i32
    %c0_i32_1 = arith.constant 0 : i32
    return %c0_i32, %c0_i32_0 : i32, i32
  }
  func.func @transform_1(%arg0: i32) -> (i32, i32) {
    %c0_i32 = arith.constant 0 : i32
    %c0_i32_0 = arith.constant 0 : i32
    %c0_i32_1 = arith.constant 0 : i32
    return %c0_i32, %c0_i32_0 : i32, i32
  }
  func.func @transform_2(%arg0: i32) -> (i32, i32) {
    %c0_i32 = arith.constant 0 : i32
    %c0_i32_0 = arith.constant 0 : i32
    %c0_i32_1 = arith.constant 0 : i32
    return %c0_i32, %c0_i32_0 : i32, i32
  }
}

</mosaic_0001>

<bundles_post_ra>
// kernel: tpu_custom_call.1
= control target key start
LH: loop header
LB: loop body
LE: loop exit
PB: predicated region body
PF: predicated region fallthrough
CT: control target
= control target key end

     0   :  { %7 = vsyncpa [#allocation3], 0  ;;  %s178_s0 = inlined_call_operand.hbm [shape: u8[12,30], index: 0, kind: input, shape index: {}]   ;;  %s179_s1 = inlined_call_operand.vmem [shape: f32[1,48], index: 1, kind: input, shape index: {}]   ;;  %s180_s2 = inlined_call_operand.hbm [shape: f32[16,48], index: 2, kind: output, shape index: {}]  }
   0x1   :  { %8 = vsyncpa [#allocation4], 0  ;;  %s129_s9 = smov [#allocation2]   ;;  %s81_s13 = scalar_lea.hbm %s178_s0, 64 }
   0x2   :  { %s14_s10 = sshll.u32 %s129_s9, 4  ;;  %p82_p0 = scmp.ne.s32.totalorder %s178_s0, %s81_s13  ;;  %s15_s10 = int_to_ptr.vmem [resolvable:$true] %s14_s10 }
   0x3   :  { %p85_p1 = scmp.lt.u32.totalorder %s81_s13, %s178_s0 }
   0x5   :  { %p87_p2 = pnand %p85_p1, %p82_p0 }
   0x7   :  { %90 = shalt.err (!%p87_p2)
}
   0x8   :  { %s91_s18 = scalar_lea.vmem %s15_s10, 64  ;;  %p96_p4 = scmp.lt.s32.totalorder %s15_s10, %s15_s10 }
   0x9   :  { %p92_p3 = scmp.ne.s32.totalorder %s15_s10, %s91_s18  ;;  %p97_p5 = scmp.lt.s32.totalorder %s91_s18, %s91_s18 }
   0xb   :  { %p98_p6 = por %p97_p5, %p96_p4 }
   0xd   :  { %p99_p7 = pnand %p98_p6, %p92_p3 }
   0xf   :  { %102 = shalt.err (!%p99_p7)
}
  0x10   :  { %s130_s19 = smov 32   ;;  %s131_s20 = smov 2  }
  0x11   :  { %20 = dma.hbm_to_vmem [thread:$0]  %s178_s0, 64, %s15_s10, [#allocation3], %s130_s19, %s130_s19, %s131_s20  }
  0x12   :  { %125 = dma.done.wait [#allocation3], 64  }
  0x13   :  { %126 = vsyncadd [#allocation3], 4294967232  ;;  %vm33_vm0 = vcmask 392192   ;;  %v36_v0 = vld [vmem:[#allocation2] sm:$0x3]  ;;  %s132_s25 = smov 9  }
  0x14   :  { %v37_v1 = vld [vmem:[#allocation2 + $0x2] sm:$0x1]  ;;  %v73_v2 = vld [vmem:[%s179_s1] ss:$0 sm:$0xff]  ;;  %v38_v3 = vunpack.c.0.s8 %v36_v0  ;;  %vm52_vm1 = vcmask 318536   ;;  %s133_s0 = smov [#allocation5]  }
  0x15   :  { %v39_v4 = vunpack.c.0.s8 %v37_v1  ;;  %34 = vst.msk [vmem:[#allocation5] sm:$0xff] %vm33_vm0, %v73_v2  ;;  %35 = vst.msk [vmem:[#allocation5 + $0x8] sm:$0xff] %vm33_vm0, %v73_v2  ;;  %s61_s26 = sshll.u32 %s133_s0, 4  ;;  %vm54_vm2 = vcmask 314440   ;;  %s62_s26 = int_to_ptr.vmem [resolvable:$true] %s61_s26 }
  0x16   :  { %v40_v5 = vand.u32 255, %v38_v3  ;;  %s103_s1 = scalar_lea.vmem %s62_s26, 256  ;;  %p108_p9 = scmp.lt.s32.totalorder %s62_s26, %s62_s26 }
  0x17   :  { %v41_v6 = vand.u32 255, %v39_v4  ;;  %p104_p8 = scmp.ne.s32.totalorder %s62_s26, %s103_s1  ;;  %p109_p10 = scmp.lt.s32.totalorder %s103_s1, %s103_s1 }
  0x18   :  { %v42_v7 = vcvt.s32.f32 %v40_v5 }
  0x19   :  { %v43_v8 = vcvt.s32.f32 %v41_v6  ;;  %p110_p11 = por %p109_p10, %p108_p9 }
  0x1a   :  { %46 = vrot.lane.b32.xlu0 %v42_v7, %s132_s25 }
  0x1b   :  { %p111_p12 = pnand %p110_p11, %p104_p8 }
  0x1e   :  { %48 = vrot.lane.b32.xlu0 %v43_v8, %s132_s25 }
  0x8c   :  { %v47_v9 = vpop.permute.xlu0 %46 }
  0x8d   :  { %53 = vst.msk [vmem:[#allocation5 + $0x2] sm:$0xff] %vm52_vm1, %v47_v9 }
  0x90   :  { %v49_v10 = vpop.permute.xlu0 %48 }
  0x91   :  { %55 = vst.msk [vmem:[#allocation5 + $0xa] sm:$0xf] %vm54_vm2, %v49_v10 }
  0x92   :  { %114 = shalt.err (!%p111_p12)
}
  0x93   :  { %s115_s29 = scalar_lea.hbm %s180_s2, 256 }
  0x94   :  { %p116_p13 = scmp.ne.s32.totalorder %s180_s2, %s115_s29  ;;  %p119_p0 = scmp.lt.u32.totalorder %s115_s29, %s180_s2 }
  0x96   :  { %p121_p1 = pnand %p119_p0, %p116_p13 }
  0x98   :  { %124 = shalt.err (!%p121_p1)
}
  0x99   :  { %s134_s6 = smov 128   ;;  %s135_s7 = smov 8  }
  0x9a   :  { %67 = dma.vmem_to_hbm [thread:$0]  %s62_s26, 256, %s180_s2, [#allocation4], %s134_s6, %s134_s6, %s135_s7  }
  0x9b   :  { %127 = dma.done.wait [#allocation4], 256  }
  0x9c   :  { %128 = vsyncadd [#allocation4], 4294967040 }
  0x9d   :  { %71 = vsyncpa [#allocation3], 1 }
  0x9e   :  { %72 = vsyncpa [#allocation4], 1 }

</bundles_post_ra>
